<compile_context>
chip_gen: v7x
topology: tpu7x:2x2x1
jax: 0.10.0
libtpu: 0.0.40
codegen_flags: <defaults>
</compile_context>

<pallas_src>
import functools

import jax
import jax.numpy as jnp
from jax.experimental import pallas as pl
from jax.experimental.pallas import tpu as pltpu

HIDDEN = 128
LANE = 128
SUBLANE = 8

# Row layout of the packed f32 "aux" operand (w1 + the three biases).
# Every section starts on a sublane (8-row) boundary so in-kernel slices are
# tile-aligned.
_W1_ROW = 0          # rows 0..d_in-1 : layer1 weight (d_in, 128), zero padded to 8 rows
_B1_ROW = 8          # row 8  : bias1 (128,)
_B2_ROW = 16         # row 16 : bias2 (128,)
_B3_ROW = 24         # row 24 : bias3 zero padded to (128,)
_AUX_ROWS = 32

_OUT_PAD = 8         # narrow, sublane-aligned logits width (>= d_out = 3)
_MAX_TILE = 4096     # VMEM-safe cap (x/out blocks are lane-padded: ~2 KB/row double-buffered)
_SPLIT_MIN = 256     # only split a single-tile batch across cores when it's at least this big


def _round_up(n, m):
    return ((n + m - 1) // m) * m


def _mlp_kernel(x_ref, w_ref, aux_ref, o_ref, *, d_in, out_pad):
    """y = L3(relu(L2(relu(L1(x))))) for one batch tile, fully resident in VMEM.

    x_ref   : (TILE_B, d_in)       f32   per-tile activations
    w_ref   : (2*HIDDEN, HIDDEN)   bf16  [w2 ; w3 (lane-padded)] stacked on rows
    aux_ref : (_AUX_ROWS, HIDDEN)  f32   [w1 (row-padded) ; b1 ; b2 ; b3 (padded)]
    o_ref   : (TILE_B, out_pad)    f32   narrow logits (real cols sliced by wrapper)
    """
    x = x_ref[...]                                           # (TB, d_in) f32

    # ---- layer1 + ReLU: K = d_in is tiny, so do it on the VPU as d_in rank-1
    #      FMAs (f32, v5e-friendly) instead of a 64x zero-padded MXU matmul.
    w1 = aux_ref[_W1_ROW:_W1_ROW + SUBLANE, :]               # (8, 128) f32 value
    h1 = aux_ref[_B1_ROW:_B1_ROW + 1, :]                     # (1, 128) bias
    for i in range(d_in):                                    # static unroll (d_in == 2)
        h1 = h1 + x[:, i:i + 1] * w1[i:i + 1, :]
    h1 = jnp.maximum(h1, 0.0)                                # (TB, 128) f32

    # ---- layer2 + ReLU (MXU, bf16 inputs, f32 accumulation)
    w2 = w_ref[0:HIDDEN, :]                                  # (128, 128) bf16
    h2 = jnp.dot(h1.astype(jnp.bfloat16), w2, preferred_element_type=jnp.float32)
    h2 = jnp.maximum(h2 + aux_ref[_B2_ROW:_B2_ROW + 1, :], 0.0)

    # ---- layer3 (MXU, no activation); store only the narrow logits window.
    w3 = w_ref[HIDDEN:2 * HIDDEN, :]                         # (128, 128) bf16
    out = jnp.dot(h2.astype(jnp.bfloat16), w3, preferred_element_type=jnp.float32)
    o_ref[...] = (out[:, :out_pad]
                  + aux_ref[_B3_ROW:_B3_ROW + 1, :out_pad]).astype(o_ref.dtype)


def prepare_params(params):
    """One-time packing of the f32 Linear params into kernel operands.

    Done ONCE, outside the hot forward path:
      * w2 and (lane-padded) w3 are cast to bf16 and stacked -> (256, 128).
      * w1 and the three biases are packed into one small f32 (32, 128) array.
    """
    w1, b1, w2, b2, w3, b3 = (params[k] for k in ("w1", "b1", "w2", "b2", "w3", "b3"))
    d_in = int(w1.shape[0])
    d_out = int(w3.shape[1])
    assert w1.shape == (d_in, HIDDEN) and w2.shape == (HIDDEN, HIDDEN)
    assert w3.shape == (HIDDEN, d_out)
    assert d_in <= SUBLANE and d_out <= _OUT_PAD, "packing assumes tiny in/out feature dims"

    w3_p = jnp.pad(w3, ((0, 0), (0, LANE - d_out)))
    w_packed = jnp.concatenate([w2, w3_p], axis=0).astype(jnp.bfloat16)   # (256, 128)

    aux = jnp.zeros((_AUX_ROWS, LANE), jnp.float32)
    aux = aux.at[_W1_ROW:_W1_ROW + d_in, :].set(w1.astype(jnp.float32))
    aux = aux.at[_B1_ROW, :].set(b1.astype(jnp.float32))
    aux = aux.at[_B2_ROW, :].set(b2.astype(jnp.float32))
    aux = aux.at[_B3_ROW, :d_out].set(b3.astype(jnp.float32))

    return {"w_packed": w_packed, "aux": aux, "d_in": d_in, "d_out": d_out}


def mlp_forward(x, prep, *, tile_b=2048):
    """x: (B, d_in) f32 -> (B, d_out) f32 logits."""
    B, d_in = x.shape
    assert d_in == prep["d_in"]
    d_out = prep["d_out"]
    w_packed, aux = prep["w_packed"], prep["aux"]

    # Batch tiling: pad B to a multiple of the tile (only per-call padding left).
    tile_b = min(int(tile_b), _MAX_TILE)                     # v7x VMEM-safe cap
    b8 = max(SUBLANE, _round_up(B, SUBLANE))
    tile = min(tile_b, b8)
    # If a large batch would otherwise be a single grid step, split it in two so
    # the "parallel" batch axis can be sharded across v7x's two TensorCores.
    if tile >= b8 and b8 >= _SPLIT_MIN:
        tile = _round_up((b8 + 1) // 2, SUBLANE)
    b_p = _round_up(b8, tile)
    x_p = x if b_p == B else jnp.pad(x, ((0, b_p - B), (0, 0)))
    grid = (b_p // tile,)

    flops = 2 * b_p * (d_in * HIDDEN + HIDDEN * HIDDEN + HIDDEN * LANE)
    bytes_accessed = (x_p.size * 4 + w_packed.size * 2 + aux.size * 4
                      + b_p * _OUT_PAD * 4)

    out_p = pl.pallas_call(
        functools.partial(_mlp_kernel, d_in=d_in, out_pad=_OUT_PAD),
        out_shape=jax.ShapeDtypeStruct((b_p, _OUT_PAD), jnp.float32),
        grid=grid,
        in_specs=[
            pl.BlockSpec((tile, d_in), lambda i: (i, 0)),     # per-tile activations
            pl.BlockSpec(w_packed.shape, lambda i: (0, 0)),   # resident bf16 weights
            pl.BlockSpec(aux.shape, lambda i: (0, 0)),        # resident w1 + biases
        ],
        out_specs=pl.BlockSpec((tile, _OUT_PAD), lambda i: (i, 0)),  # narrow writeback
        compiler_params=pltpu.CompilerParams(dimension_semantics=("parallel",)),
        cost_estimate=pl.CostEstimate(
            flops=flops, transcendentals=0, bytes_accessed=bytes_accessed),
    )(x_p, w_packed, aux)

    return out_p[:B, :d_out]


def init_params(key, input_dim, output_dim):
    """Kaiming-normal weights (stored as (in, out) = PyTorch weight.T), small random biases."""
    k1, k2, k3, kb1, kb2, kb3 = jax.random.split(key, 6)

    def kaiming(k, fan_in, shape):
        std = (2.0 / fan_in) ** 0.5
        return std * jax.random.normal(k, shape, dtype=jnp.float32)

    return {
        "w1": kaiming(k1, input_dim, (input_dim, HIDDEN)),
        "b1": 0.05 * jax.random.normal(kb1, (HIDDEN,), jnp.float32),
        "w2": kaiming(k2, HIDDEN, (HIDDEN, HIDDEN)),
        "b2": 0.05 * jax.random.normal(kb2, (HIDDEN,), jnp.float32),
        "w3": kaiming(k3, HIDDEN, (HIDDEN, output_dim)),
        "b3": 0.05 * jax.random.normal(kb3, (output_dim,), jnp.float32),
    }


def _reference_f32(x, p):
    h1 = jnp.maximum(x @ p["w1"] + p["b1"], 0.0)
    h2 = jnp.maximum(h1 @ p["w2"] + p["b2"], 0.0)
    return h2 @ p["w3"] + p["b3"]


def _reference_matched(x, p):
    """Same numerics as the kernel: f32 layer1, bf16 weights/acts + f32 accum for L2/L3."""
    h1 = jnp.maximum(x @ p["w1"] + p["b1"], 0.0)
    h2 = jnp.dot(h1.astype(jnp.bfloat16), p["w2"].astype(jnp.bfloat16),
                 preferred_element_type=jnp.float32) + p["b2"]
    h2 = jnp.maximum(h2, 0.0)
    return jnp.dot(h2.astype(jnp.bfloat16), p["w3"].astype(jnp.bfloat16),
                   preferred_element_type=jnp.float32) + p["b3"]


if __name__ == "__main__":
    # MountainCar-v0: observation dim = 2, action dim = 3.
    input_dim, output_dim, batch = 2, 3, 8

    key = jax.random.PRNGKey(0)
    kx, kp, kx2 = jax.random.split(key, 3)
    x = jax.random.normal(kx, (batch, input_dim), dtype=jnp.float32)
    params = init_params(kp, input_dim, output_dim)

    prep = prepare_params(params)              # one-time param prep (outside hot path)

    # Small (serving-sized) batch: single grid step.
    out = jax.block_until_ready(mlp_forward(x, prep))
    assert out.shape == (batch, output_dim), out.shape
    ref_matched = _reference_matched(x, params)
    ref_f32 = _reference_f32(x, params)
    assert jnp.allclose(out, ref_matched, atol=2e-3, rtol=2e-3), \
        "mismatch vs matched-precision (bf16-weight) reference"
    assert jnp.allclose(out, ref_f32, atol=5e-2, rtol=5e-2), \
        "mismatch vs pure-f32 reference"

    # Multi-tile batch: exercises the grid>1 / 2-TensorCore split + padding path.
    x_big = jax.random.normal(kx2, (272, input_dim), dtype=jnp.float32)
    out_big = jax.block_until_ready(mlp_forward(x_big, prep))
    assert out_big.shape == (272, output_dim), out_big.shape
    assert jnp.allclose(out_big, _reference_matched(x_big, params), atol=2e-3, rtol=2e-3), \
        "multi-tile mismatch vs matched-precision reference"

    print("KERNEL_OK")
</pallas_src>

<mosaic_0001>
module attributes {stable_mosaic.version = 11 : i64} {
  func.func @_mlp_kernel(%arg0: i32, %arg1: memref<8x2xf32, #tpu.memory_space<vmem>>, %arg2: memref<256x128xbf16, #tpu.memory_space<vmem>>, %arg3: memref<32x128xf32, #tpu.memory_space<vmem>>, %arg4: memref<8x8xf32, #tpu.memory_space<vmem>>) attributes {dimension_semantics = [#tpu.dimension_semantics<parallel>], iteration_bounds = array<i64: 1>, scalar_prefetch = 0 : i64, scratch_operands = 0 : i64, tpu.core_type = #tpu.core_type<tc>, window_params = [{transform_indices = @transform_0, window_bounds = array<i64: 8, 2>}, {pipeline_mode = #tpu.pipeline_mode<synchronous>, transform_indices = @transform_1, window_bounds = array<i64: 256, 128>}, {pipeline_mode = #tpu.pipeline_mode<synchronous>, transform_indices = @transform_2, window_bounds = array<i64: 32, 128>}, {transform_indices = @transform_3, window_bounds = array<i64: 8, 8>}]} {
    %c0 = arith.constant 0 : index
    %c0_0 = arith.constant 0 : index
    %0 = vector.load %arg1[%c0, %c0_0] : memref<8x2xf32, #tpu.memory_space<vmem>>, vector<8x2xf32>
    %c0_1 = arith.constant 0 : index
    %c0_2 = arith.constant 0 : index
    %1 = vector.load %arg3[%c0_1, %c0_2] : memref<32x128xf32, #tpu.memory_space<vmem>>, vector<8x128xf32>
    %c8 = arith.constant 8 : index
    %c0_3 = arith.constant 0 : index
    %2 = vector.load %arg3[%c8, %c0_3] : memref<32x128xf32, #tpu.memory_space<vmem>>, vector<1x128xf32>
    %3 = vector.extract_strided_slice %0 {offsets = [0, 0], sizes = [8, 1], strides = [1, 1]} : vector<8x2xf32> to vector<8x1xf32>
    %4 = vector.extract_strided_slice %1 {offsets = [0, 0], sizes = [1, 128], strides = [1, 1]} : vector<8x128xf32> to vector<1x128xf32>
    %5 = vector.broadcast %3 : vector<8x1xf32> to vector<8x128xf32>
    %6 = vector.broadcast %4 : vector<1x128xf32> to vector<8x128xf32>
    %7 = arith.mulf %5, %6 : vector<8x128xf32>
    %8 = vector.broadcast %2 : vector<1x128xf32> to vector<8x128xf32>
    %9 = arith.addf %8, %7 : vector<8x128xf32>
    %10 = vector.extract_strided_slice %0 {offsets = [0, 1], sizes = [8, 1], strides = [1, 1]} : vector<8x2xf32> to vector<8x1xf32>
    %11 = vector.extract_strided_slice %1 {offsets = [1, 0], sizes = [1, 128], strides = [1, 1]} : vector<8x128xf32> to vector<1x128xf32>
    %12 = vector.broadcast %10 : vector<8x1xf32> to vector<8x128xf32>
    %13 = vector.broadcast %11 : vector<1x128xf32> to vector<8x128xf32>
    %14 = arith.mulf %12, %13 : vector<8x128xf32>
    %15 = arith.addf %9, %14 : vector<8x128xf32>
    %cst = arith.constant 0.000000e+00 : f32
    %16 = vector.broadcast %cst : f32 to vector<8x128xf32>
    %17 = arith.maximumf %15, %16 : vector<8x128xf32>
    %c0_4 = arith.constant 0 : index
    %c0_5 = arith.constant 0 : index
    %18 = vector.load %arg2[%c0_4, %c0_5] : memref<256x128xbf16, #tpu.memory_space<vmem>>, vector<128x128xbf16>
    %19 = arith.truncf %17 : vector<8x128xf32> to vector<8x128xbf16>
    %cst_6 = arith.constant dense<0.000000e+00> : vector<8x128xf32>
    %20 = tpu.matmul %19, %18, %cst_6 {dimension_numbers = #tpu.dot_dimension_numbers<[1], [0], [0], [1], [0, 0, 1, 1], [], []>} : vector<8x128xbf16>, vector<128x128xbf16>, vector<8x128xf32> -> vector<8x128xf32>
    %c16 = arith.constant 16 : index
    %c0_7 = arith.constant 0 : index
    %21 = vector.load %arg3[%c16, %c0_7] : memref<32x128xf32, #tpu.memory_space<vmem>>, vector<1x128xf32>
    %22 = vector.broadcast %21 : vector<1x128xf32> to vector<8x128xf32>
    %23 = arith.addf %20, %22 : vector<8x128xf32>
    %cst_8 = arith.constant 0.000000e+00 : f32
    %24 = vector.broadcast %cst_8 : f32 to vector<8x128xf32>
    %25 = arith.maximumf %23, %24 : vector<8x128xf32>
    %c128 = arith.constant 128 : index
    %c0_9 = arith.constant 0 : index
    %26 = vector.load %arg2[%c128, %c0_9] : memref<256x128xbf16, #tpu.memory_space<vmem>>, vector<128x128xbf16>
    %27 = arith.truncf %25 : vector<8x128xf32> to vector<8x128xbf16>
    %cst_10 = arith.constant dense<0.000000e+00> : vector<8x128xf32>
    %28 = tpu.matmul %27, %26, %cst_10 {dimension_numbers = #tpu.dot_dimension_numbers<[1], [0], [0], [1], [0, 0, 1, 1], [], []>} : vector<8x128xbf16>, vector<128x128xbf16>, vector<8x128xf32> -> vector<8x128xf32>
    %29 = vector.extract_strided_slice %28 {offsets = [0, 0], sizes = [8, 8], strides = [1, 1]} : vector<8x128xf32> to vector<8x8xf32>
    %c24 = arith.constant 24 : index
    %c0_11 = arith.constant 0 : index
    %30 = vector.load %arg3[%c24, %c0_11] : memref<32x128xf32, #tpu.memory_space<vmem>>, vector<1x8xf32>
    %31 = vector.broadcast %30 : vector<1x8xf32> to vector<8x8xf32>
    %32 = arith.addf %29, %31 : vector<8x8xf32>
    %c0_12 = arith.constant 0 : index
    %c0_13 = arith.constant 0 : index
    %33 = vector.load %arg4[%c0_12, %c0_13] : memref<8x8xf32, #tpu.memory_space<vmem>>, vector<8x8xf32>
    tpu.vector_store %arg4[%c0_12, %c0_13], %32 {strides = array<i32>} : memref<8x8xf32, #tpu.memory_space<vmem>>, vector<8x8xf32>,
    return
  }
  func.func @transform_0(%arg0: i32) -> (i32, i32) {
    %c0_i32 = arith.constant 0 : i32
    %c0_i32_0 = arith.constant 0 : i32
    return %arg0, %c0_i32 : i32, i32
  }
  func.func @transform_1(%arg0: i32) -> (i32, i32) {
    %c0_i32 = arith.constant 0 : i32
    %c0_i32_0 = arith.constant 0 : i32
    %c0_i32_1 = arith.constant 0 : i32
    return %c0_i32, %c0_i32_0 : i32, i32
  }
  func.func @transform_2(%arg0: i32) -> (i32, i32) {
    %c0_i32 = arith.constant 0 : i32
    %c0_i32_0 = arith.constant 0 : i32
    %c0_i32_1 = arith.constant 0 : i32
    return %c0_i32, %c0_i32_0 : i32, i32
  }
  func.func @transform_3(%arg0: i32) -> (i32, i32) {
    %c0_i32 = arith.constant 0 : i32
    %c0_i32_0 = arith.constant 0 : i32
    return %arg0, %c0_i32 : i32, i32
  }
}

</mosaic_0001>

<bundles_post_ra>
// kernel: tpu_custom_call.1
= control target key start
LH: loop header
LB: loop body
LE: loop exit
PB: predicated region body
PF: predicated region fallthrough
CT: control target
= control target key end

     0   :  { %8 = vsyncpa [#allocation3], 0  ;;  %s579_s0 = inlined_call_operand.vmem [shape: f32[8,2], index: 0, kind: input, shape index: {}]   ;;  %s580_s1 = inlined_call_operand.hbm [shape: bf16[256,128], index: 1, kind: input, shape index: {}]   ;;  %s581_s2 = inlined_call_operand.hbm [shape: f32[32,128], index: 2, kind: input, shape index: {}]   ;;  %s582_s3 = inlined_call_operand.hbm [shape: f32[8,8], index: 3, kind: output, shape index: {}]  }
   0x1   :  { %9 = vsyncpa [#allocation6], 0 }
   0x2   :  { %10 = vsyncpa [#allocation4], 0  ;;  %s491_s12 = smov [#allocation2]   ;;  %s419_s16 = scalar_lea.hbm %s580_s1, 2048 }
   0x3   :  { %s18_s13 = sshll.u32 %s491_s12, 4  ;;  %p420_p0 = scmp.ne.s32.totalorder %s580_s1, %s419_s16  ;;  %s19_s13 = int_to_ptr.vmem [resolvable:$true] %s18_s13 }
   0x4   :  { %p423_p1 = scmp.lt.u32.totalorder %s419_s16, %s580_s1 }
   0x6   :  { %p425_p2 = pnand %p423_p1, %p420_p0 }
   0x8   :  { %428 = shalt.err (!%p425_p2)
}
   0x9   :  { %s429_s21 = scalar_lea.vmem %s19_s13, 2048  ;;  %p434_p4 = scmp.lt.s32.totalorder %s19_s13, %s19_s13 }
   0xa   :  { %p430_p3 = scmp.ne.s32.totalorder %s19_s13, %s429_s21  ;;  %p435_p5 = scmp.lt.s32.totalorder %s429_s21, %s429_s21 }
   0xc   :  { %p436_p6 = por %p435_p5, %p434_p4 }
   0xe   :  { %p437_p7 = pnand %p436_p6, %p430_p3 }
  0x10   :  { %440 = shalt.err (!%p437_p7)
}
  0x11   :  { %s492_s22 = smov 64   ;;  %s493_s23 = smov 4  }
  0x12   :  { %24 = dma.hbm_to_vmem [thread:$0]  %s580_s1, 2048, %s19_s13, [#allocation3], %s492_s22, %s492_s22, %s493_s23  }
  0x13   :  { %s494_s26 = smov [#allocation5]   ;;  %s441_s30 = scalar_lea.hbm %s581_s2, 512 }
  0x14   :  { %s30_s27 = sshll.u32 %s494_s26, 4  ;;  %p442_p8 = scmp.ne.s32.totalorder %s581_s2, %s441_s30  ;;  %s31_s27 = int_to_ptr.vmem [resolvable:$true] %s30_s27 }
  0x15   :  { %p445_p9 = scmp.lt.u32.totalorder %s441_s30, %s581_s2 }
  0x17   :  { %p447_p10 = pnand %p445_p9, %p442_p8 }
  0x19   :  { %450 = shalt.err (!%p447_p10)
}
  0x1a   :  { %s451_s8 = scalar_lea.vmem %s31_s27, 512  ;;  %p456_p12 = scmp.lt.s32.totalorder %s31_s27, %s31_s27 }
  0x1b   :  { %p452_p11 = scmp.ne.s32.totalorder %s31_s27, %s451_s8  ;;  %p457_p13 = scmp.lt.s32.totalorder %s451_s8, %s451_s8 }
  0x1d   :  { %p458_p0 = por %p457_p13, %p456_p12 }
  0x1f   :  { %p459_p1 = pnand %p458_p0, %p452_p11 }
  0x21   :  { %462 = shalt.err (!%p459_p1)
}
  0x22   :  { %s495_s1 = smov 128   ;;  %s496_s9 = smov 8  }
  0x23   :  { %36 = dma.hbm_to_vmem [thread:$0]  %s581_s2, 512, %s31_s27, [#allocation6], %s495_s1, %s495_s1, %s496_s9  }
  0x24   :  { %485 = dma.done.wait [#allocation3], 2048  }
  0x25   :  { %486 = vsyncadd [#allocation3], 4294965248 }
  0x26   :  { %487 = dma.done.wait [#allocation6], 512  }
  0x27   :  { %488 = vsyncadd [#allocation6], 4294966784  ;;  %v497_v0 = vmov 0   ;;  %v498_v1 = vmov 0.0   ;;  %v44_v2 = vld [vmem:[%s579_s0] sm:$0xff]  ;;  %v403_v3 = vld [vmem:[#allocation2] sm:$0xff]   ;;  %v52_v18 = vlaneseq }
  0x28   :  { %401 = vset.pattern.permute.xlu0 %v497_v0  ;;  %350 = vmatprep.subr.bf16.mxu0 %v498_v1  ;;  %v404_v4 = vld [vmem:[#allocation2 + $0x8] sm:$0xff]   ;;  %v499_v5 = vmov 1   ;;  %v405_v6 = vld [vmem:[#allocation2 + $0x10] sm:$0xff]   ;;  %v406_v7 = vld [vmem:[#allocation2 + $0x18] sm:$0xff]   ;;  %vm500_vm0 = vmmov 0   ;;  %s501_s0 = smov [#allocation7]  }
  0x29   :  { %370 = vmatprep.subr.bf16.mxu1 %v498_v1  ;;  %49 = vperm.xlu0 %401, %v44_v2   ;;  %v411_v8 = vld [vmem:[#allocation2 + $0x40] sm:$0xff]   ;;  %v412_v10 = vld [vmem:[#allocation2 + $0x48] sm:$0xff]   ;;  %v413_v12 = vld [vmem:[#allocation2 + $0x50] sm:$0xff]   ;;  %v53_v19 = vshrl.u32 %v52_v18, 7  ;;  %s303_s2 = sshll.u32 %s501_s0, 4  ;;  %vm295_vm1 = vcmask 64512   ;;  %s304_s2 = int_to_ptr.vmem [resolvable:$true] %s303_s2 }
  0x2a   :  { %351 = vmatpush3.bf16.msra.mxu0 %v403_v3  ;;  %366 = vmatprep.mubr.msk.bf16.mxu0 %vm500_vm0, %v498_v1  ;;  %v407_v9 = vld [vmem:[#allocation2 + $0x20] sm:$0xff]   ;;  %v408_v11 = vld [vmem:[#allocation2 + $0x28] sm:$0xff]   ;;  %v409_v13 = vld [vmem:[#allocation2 + $0x30] sm:$0xff]   ;;  %s463_s14 = scalar_lea.vmem %s304_s2, 128  ;;  %p468_p3 = scmp.lt.s32.totalorder %s304_s2, %s304_s2 }
  0x2b   :  { %352 = vmatprep.subr.bf16.mxu0 %v498_v1  ;;  %386 = vmatprep.mubr.msk.bf16.mxu1 %vm500_vm0, %v498_v1  ;;  %v414_v14 = vld [vmem:[#allocation2 + $0x58] sm:$0xff]   ;;  %v415_v16 = vld [vmem:[#allocation2 + $0x60] sm:$0xff]   ;;  %v416_v17 = vld [vmem:[#allocation2 + $0x68] sm:$0xff]   ;;  %v54_v20 = vsub.s32 0, %v53_v19  ;;  %v68_v23 = vsub.s32 1, %v53_v19  ;;  %p464_p2 = scmp.ne.s32.totalorder %s304_s2, %s463_s14  ;;  %p469_p4 = scmp.lt.s32.totalorder %s463_s14, %s463_s14 }
  0x2c   :  { %371 = vmatpush3.bf16.msra.mxu1 %v411_v8  ;;  %v410_v15 = vld [vmem:[#allocation2 + $0x38] sm:$0xff]   ;;  %v45_v21 = vld [vmem:[#allocation5] sm:$0xff]  ;;  %v313_v27 = vld [vmem:[#allocation5 + $0x8] ss:$0 sm:$0xff] }
  0x2d   :  { %402 = vset.pattern.permute.xlu0 %v499_v5  ;;  %372 = vmatprep.subr.bf16.mxu1 %v498_v1  ;;  %v55_v22 = vrot.slane %v45_v21, %v54_v20  ;;  %v69_v26 = vrot.slane %v45_v21, %v68_v23  ;;  %v417_v34 = vld [vmem:[#allocation2 + $0x70] sm:$0xff]   ;;  %v418_v35 = vld [vmem:[#allocation2 + $0x78] sm:$0xff]   ;;  %p470_p5 = por %p469_p4, %p468_p3 }
  0x2e   :  { %63 = vperm.xlu0 %402, %v44_v2   ;;  %353 = vmatpush3.bf16.msra.mxu0 %v404_v4  ;;  %v314_v36 = vld [vmem:[#allocation5 + $0x10] ss:$0 sm:$0xff]  ;;  %v331_v44 = vld [vmem:[#allocation5 + $0x18] ss:$0 sm:$0xff] }
  0x2f   :  { %354 = vmatprep.subr.bf16.mxu0 %v498_v1  ;;  %p471_p6 = pnand %p470_p5, %p464_p2 }
  0x30   :  { %373 = vmatpush3.bf16.msra.mxu1 %v412_v10 }
  0x31   :  { %374 = vmatprep.subr.bf16.mxu1 %v498_v1 }
  0x32   :  { %355 = vmatpush3.bf16.msra.mxu0 %v405_v6 }
  0x33   :  { %356 = vmatprep.subr.bf16.mxu0 %v498_v1 }
  0x34   :  { %375 = vmatpush3.bf16.msra.mxu1 %v413_v12 }
  0x35   :  { %376 = vmatprep.subr.bf16.mxu1 %v498_v1 }
  0x36   :  { %357 = vmatpush3.bf16.msra.mxu0 %v406_v7 }
  0x37   :  { %358 = vmatprep.subr.bf16.mxu0 %v498_v1 }
  0x38   :  { %377 = vmatpush3.bf16.msra.mxu1 %v414_v14 }
  0x39   :  { %378 = vmatprep.subr.bf16.mxu1 %v498_v1 }
  0x3a   :  { %359 = vmatpush3.bf16.msra.mxu0 %v407_v9 }
  0x3b   :  { %360 = vmatprep.subr.bf16.mxu0 %v498_v1 }
  0x3c   :  { %379 = vmatpush3.bf16.msra.mxu1 %v415_v16 }
  0x3d   :  { %380 = vmatprep.subr.bf16.mxu1 %v498_v1 }
  0x3e   :  { %361 = vmatpush3.bf16.msra.mxu0 %v408_v11 }
  0x3f   :  { %362 = vmatprep.subr.bf16.mxu0 %v498_v1 }
  0x40   :  { %381 = vmatpush3.bf16.msra.mxu1 %v416_v17 }
  0x41   :  { %382 = vmatprep.subr.bf16.mxu1 %v498_v1 }
  0x42   :  { %363 = vmatpush3.bf16.msra.mxu0 %v409_v13 }
  0x43   :  { %364 = vmatprep.subr.bf16.mxu0 %v498_v1 }
  0x44   :  { %383 = vmatpush3.bf16.msra.mxu1 %v417_v34 }
  0x45   :  { %384 = vmatprep.subr.bf16.mxu1 %v498_v1 }
  0x46   :  { %365 = vmatpush3.bf16.msra.mxu0 %v410_v15 }
  0x48   :  { %385 = vmatpush3.bf16.msra.mxu1 %v418_v35 }
  0xa8   :  { %v50_v24 = vpop.permute.xlu0 %49 }
  0xa9   :  { %v56_v25 = vmul.f32 %v55_v22, %v50_v24 }
  0xab   :  { %v61_v29 = vadd.f32 %v313_v27, %v56_v25 }
  0xad   :  { %v64_v28 = vpop.permute.xlu0 %63 }
  0xae   :  { %v70_v30 = vmul.f32 %v69_v26, %v64_v28 }
  0xb0   :  { %v71_v31 = vadd.f32 %v70_v30, %v61_v29 }
  0xb2   :  { %v72_v32 = vmax.f32 %v71_v31, 0.0 }
  0xb4   :  { %v89_v33 = vpack.c.bf16 %v72_v32, %v72_v32 }
  0xb6   :  { %367 = vmatmul.mubr.bf16.vlgmr.msra.gmra.mrb[0].mxu0 %v89_v33 }
 0x189   :  { %v177_v37 = vpop.f32.mrb[0].mxu0 }
 0x18a   :  { %v178_v38 = vadd.f32 %v314_v36, %v177_v37  ;;  %v368_v39 = vpop.f32.mrb[1].mxu0 }
 0x18b   :  { %v180_v40 = vpop.f32.mrb[2].mxu0 }
 0x18c   :  { %v183_v41 = vmax.f32 %v178_v38, 0.0  ;;  %v369_v42 = vpop.f32.mrb[3].mxu0 }
 0x18e   :  { %v200_v43 = vpack.c.bf16 %v183_v41, %v183_v41 }
 0x190   :  { %387 = vmatmul.mubr.bf16.vlgmr.msra.gmra.mrb[0].mxu1 %v200_v43 }
 0x263   :  { %v283_v45 = vpop.f32.mrb[0].mxu1 }
 0x264   :  { %v294_v46 = vadd.f32 %v331_v44, %v283_v45  ;;  %v388_v47 = vpop.f32.mrb[1].mxu1 }
 0x265   :  { %v286_v48 = vpop.f32.mrb[2].mxu1 }
 0x266   :  { %v389_v49 = vpop.f32.mrb[3].mxu1  ;;  %296 = vst.msk [vmem:[#allocation7] sm:$0xff] %vm295_vm1, %v294_v46 }
 0x267   :  { %474 = shalt.err (!%p471_p6)
}
 0x268   :  { %s475_s17 = scalar_lea.hbm %s582_s3, 128 }
 0x269   :  { %p476_p7 = scmp.ne.s32.totalorder %s582_s3, %s475_s17  ;;  %p479_p8 = scmp.lt.u32.totalorder %s475_s17, %s582_s3 }
 0x26b   :  { %p481_p9 = pnand %p479_p8, %p476_p7 }
 0x26d   :  { %484 = shalt.err (!%p481_p9)
}
 0x26e   :  { %306 = dma.vmem_to_hbm [thread:$0]  %s304_s2, 128, %s582_s3, [#allocation4]  }
 0x26f   :  { %489 = dma.done.wait [#allocation4], 128  }
 0x270   :  { %490 = vsyncadd [#allocation4], 4294967168 }
 0x271   :  { %310 = vsyncpa [#allocation3], 1 }
 0x272   :  { %311 = vsyncpa [#allocation6], 1 }
 0x273   :  { %312 = vsyncpa [#allocation4], 1 }

</bundles_post_ra>
